<compile_context>
chip_gen: v5e
topology: v5e:2x2
jax: 0.10.0
libtpu: 0.0.40
codegen_flags: <defaults>
</compile_context>

<pallas_src>
import functools

import jax
import jax.numpy as jnp
from jax import lax
from jax.experimental import pallas as pl
from jax.experimental.pallas import tpu as pltpu


def _conv_block_kernel(xt_ref, w_ref, scale_ref, shift_ref, alpha_ref, o_ref,
                       *, apply_affine, apply_act):
    # xt_ref block: (1, Cin*K*K, TP)  -- channels on sublanes, pixels on lanes
    xt = xt_ref[0]                                            # (CK, TP)
    w = w_ref[...]                                            # (Cout, CK), no .T needed
    y = jnp.dot(w, xt, preferred_element_type=jnp.float32)    # (Cout, TP)
    if apply_affine:                                          # folded BN (eval) / conv bias
        y = y * scale_ref[...] + shift_ref[...]               # (Cout, 1) bcast over lanes
    if apply_act:                                             # per-channel PReLU
        y = jnp.where(y >= 0.0, y, alpha_ref[...] * y)
    o_ref[0] = y.astype(o_ref.dtype)


def _pick_p_tile(P):
    # Lane-dense tiles; fall back to the full extent for small P.
    for t in (4096, 2048, 1024, 512):
        if P % t == 0:
            return t
    return P


def conv_block(x, weight, *, stride=(1, 1), padding=(0, 0), dilation=(1, 1),
               bias=None, bn_act=False, bn_gamma=None, bn_beta=None,
               bn_mean=None, bn_var=None, prelu_alpha=None, eps=1e-5):
    """ConvBlock forward: conv2d (+ folded BatchNorm + PReLU if bn_act). NCHW in/out."""
    B, Cin, H, W = x.shape
    Cout, Cin_w, Kh, Kw = weight.shape
    # TODO(synk): groups != 1 (grouped / depthwise Conv2d) is not implemented.
    assert Cin_w == Cin, "groups != 1 not supported"
    sh, sw = stride
    ph, pw = padding
    dh, dw = dilation
    H_out = (H + 2 * ph - dh * (Kh - 1) - 1) // sh + 1
    W_out = (W + 2 * pw - dw * (Kw - 1) - 1) // sw + 1
    P = H_out * W_out
    CK = Cin * Kh * Kw

    # Spatial zero-pad (layout plumbing in XLA); stay channel-major (NCHW).
    xp = jnp.pad(x, ((0, 0), (0, 0), (ph, ph), (pw, pw)))

    # Implicit-GEMM taps: (B, Cin*Kh*Kw, P). Index order matches
    # weight.reshape(Cout, Cin*Kh*Kw): cin-major, then kh*Kw + kw.
    taps = []
    for kh in range(Kh):
        for kw in range(Kw):
            h0, w0 = kh * dh, kw * dw
            tap = xp[:, :, h0:h0 + (H_out - 1) * sh + 1:sh,
                           w0:w0 + (W_out - 1) * sw + 1:sw]      # (B, Cin, H_out, W_out)
            taps.append(tap.reshape(B, Cin, 1, P))
    xt = jnp.concatenate(taps, axis=2).reshape(B, CK, P)

    # Conv weight (Cout, Cin, Kh, Kw) -> (Cout, Cin*Kh*Kw); no in-kernel transpose.
    wf = weight.reshape(Cout, CK).astype(jnp.float32)

    # Fold BatchNorm (inference mode) / conv bias into per-channel scale & shift.
    if bn_act:
        inv = bn_gamma / jnp.sqrt(bn_var + eps)
        scale = inv
        shift = bn_beta - bn_mean * inv
        if bias is not None:
            shift = shift + bias * inv
        alpha = prelu_alpha
        apply_affine, apply_act = True, True
    else:
        scale = jnp.ones((Cout,), jnp.float32)
        shift = bias if bias is not None else jnp.zeros((Cout,), jnp.float32)
        alpha = jnp.ones((Cout,), jnp.float32)
        apply_affine, apply_act = (bias is not None), False

    scale = scale.reshape(Cout, 1).astype(jnp.float32)
    shift = shift.reshape(Cout, 1).astype(jnp.float32)
    alpha = alpha.reshape(Cout, 1).astype(jnp.float32)

    tp = _pick_p_tile(P)
    kernel = functools.partial(_conv_block_kernel,
                               apply_affine=apply_affine, apply_act=apply_act)

    out = pl.pallas_call(
        kernel,
        out_shape=jax.ShapeDtypeStruct((B, Cout, P), x.dtype),
        grid_spec=pltpu.PrefetchScalarGridSpec(
            num_scalar_prefetch=0,
            grid=(B, P // tp),
            in_specs=[
                pl.BlockSpec((1, CK, tp), lambda b, p: (b, 0, p)),   # im2col taps
                pl.BlockSpec((Cout, CK), lambda b, p: (0, 0)),       # conv weight
                pl.BlockSpec((Cout, 1), lambda b, p: (0, 0)),        # folded BN scale
                pl.BlockSpec((Cout, 1), lambda b, p: (0, 0)),        # folded BN shift
                pl.BlockSpec((Cout, 1), lambda b, p: (0, 0)),        # PReLU alpha
            ],
            out_specs=pl.BlockSpec((1, Cout, tp), lambda b, p: (b, 0, p)),
        ),
        compiler_params=pltpu.CompilerParams(
            dimension_semantics=("parallel", "parallel")),
    )(xt, wf, scale, shift, alpha)

    # (B, Cout, P) is already channel-major -> NCHW via pure reshape, no transpose.
    return out.reshape(B, Cout, H_out, W_out)


def conv_block_ref(x, weight, *, stride=(1, 1), padding=(0, 0), dilation=(1, 1),
                   bias=None, bn_act=False, bn_gamma=None, bn_beta=None,
                   bn_mean=None, bn_var=None, prelu_alpha=None, eps=1e-5):
    """Pure-JAX reference of ConvBlock.forward (NCHW in/out)."""
    y = lax.conv_general_dilated(
        x, weight, window_strides=stride,
        padding=[(padding[0], padding[0]), (padding[1], padding[1])],
        rhs_dilation=dilation,
        dimension_numbers=("NCHW", "OIHW", "NCHW"))
    if bias is not None:
        y = y + bias.reshape(1, -1, 1, 1)
    if bn_act:
        inv = (bn_gamma / jnp.sqrt(bn_var + eps)).reshape(1, -1, 1, 1)
        y = (y - bn_mean.reshape(1, -1, 1, 1)) * inv + bn_beta.reshape(1, -1, 1, 1)
        a = prelu_alpha.reshape(1, -1, 1, 1)
        y = jnp.where(y >= 0.0, y, a * y)
    return y


if __name__ == "__main__":
    B, Cin, Cout, H, W = 2, 4, 8, 16, 16

    key = jax.random.PRNGKey(0)
    ks = jax.random.split(key, 6)

    x = jax.random.normal(ks[0], (B, Cin, H, W), dtype=jnp.float32)

    # --- config 1: 3x3 conv, stride 1, pad 1, bn_act=True (BN + PReLU) -------
    w3 = jax.random.normal(ks[1], (Cout, Cin, 3, 3), dtype=jnp.float32) * 0.2
    bn_gamma = 1.0 + 0.1 * jnp.arange(Cout, dtype=jnp.float32)
    bn_beta = 0.05 * jnp.arange(Cout, dtype=jnp.float32)
    bn_mean = jax.random.normal(ks[2], (Cout,), dtype=jnp.float32) * 0.1
    bn_var = jnp.abs(jax.random.normal(ks[3], (Cout,), dtype=jnp.float32)) + 0.5
    prelu_alpha = jnp.full((Cout,), 0.25, dtype=jnp.float32)   # PyTorch default init

    cfg = dict(stride=(1, 1), padding=(1, 1), dilation=(1, 1), bias=None,
               bn_act=True, bn_gamma=bn_gamma, bn_beta=bn_beta,
               bn_mean=bn_mean, bn_var=bn_var, prelu_alpha=prelu_alpha)
    out = jax.block_until_ready(conv_block(x, w3, **cfg))
    ref = conv_block_ref(x, w3, **cfg)
    assert out.shape == (B, Cout, H, W), out.shape
    assert jnp.allclose(out, ref, atol=1e-4, rtol=1e-4), \
        float(jnp.max(jnp.abs(out - ref)))

    # --- config 2: 1x1 conv, stride 2, no BN / act (Identity path) ------------
    w1 = jax.random.normal(ks[4], (Cout, Cin, 1, 1), dtype=jnp.float32) * 0.2
    cfg2 = dict(stride=(2, 2), padding=(0, 0), dilation=(1, 1),
                bias=None, bn_act=False)
    out2 = jax.block_until_ready(conv_block(x, w1, **cfg2))
    ref2 = conv_block_ref(x, w1, **cfg2)
    assert out2.shape == (B, Cout, H // 2, W // 2), out2.shape
    assert jnp.allclose(out2, ref2, atol=1e-4, rtol=1e-4), \
        float(jnp.max(jnp.abs(out2 - ref2)))

    print("KERNEL_OK")
</pallas_src>

<mosaic_0001>
module attributes {stable_mosaic.version = 11 : i64} {
  func.func @_conv_block_kernel(%arg0: i32, %arg1: i32, %arg2: memref<1x36x256xf32, #tpu.memory_space<vmem>>, %arg3: memref<8x36xf32, #tpu.memory_space<vmem>>, %arg4: memref<8x1xf32, #tpu.memory_space<vmem>>, %arg5: memref<8x1xf32, #tpu.memory_space<vmem>>, %arg6: memref<8x1xf32, #tpu.memory_space<vmem>>, %arg7: memref<1x8x256xf32, #tpu.memory_space<vmem>>) attributes {dimension_semantics = [#tpu.dimension_semantics<parallel>, #tpu.dimension_semantics<parallel>], iteration_bounds = array<i64: 2, 1>, scalar_prefetch = 0 : i64, scratch_operands = 0 : i64, tpu.core_type = #tpu.core_type<tc>, window_params = [{transform_indices = @transform_0, window_bounds = array<i64: 1, 36, 256>}, {pipeline_mode = #tpu.pipeline_mode<synchronous>, transform_indices = @transform_1, window_bounds = array<i64: 8, 36>}, {pipeline_mode = #tpu.pipeline_mode<synchronous>, transform_indices = @transform_2, window_bounds = array<i64: 8, 1>}, {pipeline_mode = #tpu.pipeline_mode<synchronous>, transform_indices = @transform_3, window_bounds = array<i64: 8, 1>}, {pipeline_mode = #tpu.pipeline_mode<synchronous>, transform_indices = @transform_4, window_bounds = array<i64: 8, 1>}, {transform_indices = @transform_5, window_bounds = array<i64: 1, 8, 256>}]} {
    %c0 = arith.constant 0 : index
    %c0_0 = arith.constant 0 : index
    %c0_1 = arith.constant 0 : index
    %0 = vector.load %arg2[%c0, %c0_0, %c0_1] : memref<1x36x256xf32, #tpu.memory_space<vmem>>, vector<1x36x256xf32>
    %1 = vector.shape_cast %0 : vector<1x36x256xf32> to vector<36x256xf32>
    %c0_2 = arith.constant 0 : index
    %c0_3 = arith.constant 0 : index
    %2 = vector.load %arg3[%c0_2, %c0_3] : memref<8x36xf32, #tpu.memory_space<vmem>>, vector<8x36xf32>
    %cst = arith.constant dense<0.000000e+00> : vector<8x256xf32>
    %3 = tpu.matmul %2, %1, %cst {dimension_numbers = #tpu.dot_dimension_numbers<[1], [0], [0], [1], [0, 0, 1, 1], [], []>} : vector<8x36xf32>, vector<36x256xf32>, vector<8x256xf32> -> vector<8x256xf32>
    %c0_4 = arith.constant 0 : index
    %c0_5 = arith.constant 0 : index
    %4 = vector.load %arg4[%c0_4, %c0_5] : memref<8x1xf32, #tpu.memory_space<vmem>>, vector<8x1xf32>
    %5 = vector.broadcast %4 : vector<8x1xf32> to vector<8x256xf32>
    %6 = arith.mulf %3, %5 : vector<8x256xf32>
    %c0_6 = arith.constant 0 : index
    %c0_7 = arith.constant 0 : index
    %7 = vector.load %arg5[%c0_6, %c0_7] : memref<8x1xf32, #tpu.memory_space<vmem>>, vector<8x1xf32>
    %8 = vector.broadcast %7 : vector<8x1xf32> to vector<8x256xf32>
    %9 = arith.addf %6, %8 : vector<8x256xf32>
    %cst_8 = arith.constant 0.000000e+00 : f32
    %10 = vector.broadcast %cst_8 : f32 to vector<8x256xf32>
    %11 = arith.cmpf oge, %9, %10 : vector<8x256xf32>
    %c0_9 = arith.constant 0 : index
    %c0_10 = arith.constant 0 : index
    %12 = vector.load %arg6[%c0_9, %c0_10] : memref<8x1xf32, #tpu.memory_space<vmem>>, vector<8x1xf32>
    %13 = vector.broadcast %12 : vector<8x1xf32> to vector<8x256xf32>
    %14 = arith.mulf %13, %9 : vector<8x256xf32>
    %15 = arith.select %11, %9, %14 : vector<8x256xi1>, vector<8x256xf32>
    %c0_11 = arith.constant 0 : index
    %c0_12 = arith.constant 0 : index
    %c0_13 = arith.constant 0 : index
    %16 = vector.load %arg7[%c0_11, %c0_12, %c0_13] : memref<1x8x256xf32, #tpu.memory_space<vmem>>, vector<1x8x256xf32>
    %17 = vector.shape_cast %16 : vector<1x8x256xf32> to vector<8x256xf32>
    %18 = vector.shape_cast %15 : vector<8x256xf32> to vector<1x8x256xf32>
    tpu.vector_store %arg7[%c0_11, %c0_12, %c0_13], %18 {strides = array<i32>} : memref<1x8x256xf32, #tpu.memory_space<vmem>>, vector<1x8x256xf32>,
    return
  }
  func.func @transform_0(%arg0: i32, %arg1: i32) -> (i32, i32, i32) {
    %c0_i32 = arith.constant 0 : i32
    %c0_i32_0 = arith.constant 0 : i32
    return %arg0, %c0_i32, %arg1 : i32, i32, i32
  }
  func.func @transform_1(%arg0: i32, %arg1: i32) -> (i32, i32) {
    %c0_i32 = arith.constant 0 : i32
    %c0_i32_0 = arith.constant 0 : i32
    %c0_i32_1 = arith.constant 0 : i32
    return %c0_i32, %c0_i32_0 : i32, i32
  }
  func.func @transform_2(%arg0: i32, %arg1: i32) -> (i32, i32) {
    %c0_i32 = arith.constant 0 : i32
    %c0_i32_0 = arith.constant 0 : i32
    %c0_i32_1 = arith.constant 0 : i32
    return %c0_i32, %c0_i32_0 : i32, i32
  }
  func.func @transform_3(%arg0: i32, %arg1: i32) -> (i32, i32) {
    %c0_i32 = arith.constant 0 : i32
    %c0_i32_0 = arith.constant 0 : i32
    %c0_i32_1 = arith.constant 0 : i32
    return %c0_i32, %c0_i32_0 : i32, i32
  }
  func.func @transform_4(%arg0: i32, %arg1: i32) -> (i32, i32) {
    %c0_i32 = arith.constant 0 : i32
    %c0_i32_0 = arith.constant 0 : i32
    %c0_i32_1 = arith.constant 0 : i32
    return %c0_i32, %c0_i32_0 : i32, i32
  }
  func.func @transform_5(%arg0: i32, %arg1: i32) -> (i32, i32, i32) {
    %c0_i32 = arith.constant 0 : i32
    %c0_i32_0 = arith.constant 0 : i32
    return %arg0, %c0_i32, %arg1 : i32, i32, i32
  }
}

</mosaic_0001>

<bundles_post_ra>
// kernel: tpu_custom_call.1
= control target key start
LH: loop header
LB: loop body
LE: loop exit
PB: predicated region body
PF: predicated region fallthrough
CT: control target
= control target key end

     0   :  { %10 = vsyncpa [#allocation3], 0  ;;  %s737_s0 = inlined_call_operand.vmem [shape: f32[2,36,256], index: 0, kind: input, shape index: {}]   ;;  %s738_s1 = inlined_call_operand.vmem [shape: f32[8,36], index: 1, kind: input, shape index: {}]   ;;  %s739_s2 = inlined_call_operand.vmem [shape: f32[8,1], index: 2, kind: input, shape index: {}]   ;;  %s740_s3 = inlined_call_operand.vmem [shape: f32[8,1], index: 3, kind: input, shape index: {}]   ;;  %s741_s4 = inlined_call_operand.vmem [shape: f32[8,1], index: 4, kind: input, shape index: {}]   ;;  %s742_s5 = inlined_call_operand.hbm [shape: f32[2,8,256], index: 5, kind: output, shape index: {}]  }
   0x1   :  { %12 = vsyncpa [#allocation3 + $0x1], 0  ;;  %s628_s18 = smov 0   ;;  %s630_s19 = smov 0  }
   0x2   :  { %s632_s20 = smov 0   ;;  %s634_s21 = smov 0  }
   0x3   :  { %s636_s22 = smov 0   ;;  %s638_s23 = smov 0  }
   0x4 LB: > { %s441_s24 = sadd.s32 4294967295, %s595_s23   ;;  %s442_s25 = sadd.s32 4294967294, %s595_s23   ;;  %s595_s23 = sphi %s638_s23, %s18_s23   ;;  %s591_s22 = sphi %s636_s22, %s749_s22   ;;  %s587_s21 = sphi %s634_s21, %s748_s21   ;;  %s583_s20 = sphi %s632_s20, %s747_s20   ;;  %s579_s19 = sphi %s630_s19, %s746_s19   ;;  %s575_s18 = sphi %s628_s18, %s745_s18  }
   0x5   : > { %s30_s26 = sadd.s32 1, %s591_s22  ;;  %s151_s27 = sadd.s32 1, %s583_s20 }
   0x6   : > { %p32_p0 = scmp.ge.s32.totalorder %s30_s26, 2  ;;  %p161_p1 = scmp.ne.s32.totalorder %s583_s20, %s579_s19 }
   0x7   : > { %p162_p2 = scmp.eq.s32.totalorder %s441_s24, 1  ;;  %p167_p3 = scmp.ne.s32.totalorder %s579_s19, %s575_s18 }
   0x8   : > { %s751_s26 = smov (%p32_p0, %s30_s26), 0  ;;  %p168_p5 = scmp.eq.s32.totalorder %s442_s25, 1 }
   0x9   : > { %p668_p4 = por %p162_p2, %p161_p1  ;;  %s146_s29 = ssub.s32 %s591_s22, %s751_s26 }
   0xa   : > { %p445_p6 = scmp.ge.s32.totalorder %s595_s23, 1  ;;  %p149_p7 = scmp.eq.s32.totalorder %s146_s29, 0 }
   0xb   : > { %p675_p8 = por %p168_p5, %p167_p3  ;;  %p211_p9 = scmp.lt.s32.totalorder %s595_s23, 3 }
   0xc   : > { %s681_s6 = scalar_select %p149_p7, %s583_s20, %s151_s27  }
   0xd   : > { %p212_p10 = pnand %p445_p6, %p211_p9 }
   0xe   : > { %p244_p11 = scmp.lt.s32.totalorder (!%p212_p10), %s587_s21, 1  ;;  %s240_s27 = sand.u32 (!%p212_p10), 1, %s579_s19  }
   0xf   : > { %215 = sbr.rel (%p212_p10) target bundleno = 172 (0xac), region = 40  ;;  %s446_s29 = sshll.u32 (!%p212_p10), %s240_s27, 4 }
  0x10   : > { %s457_s7 = sshll.u32 (!%p212_p10), %s587_s21, 4  ;;  %s537_s24 = scalar_lea.hbm (!%p212_p10), %s742_s5, 32 }
  0x11   : > { %s360_s10 = scalar_lea.hbm (!%p212_p10), %s742_s5, %s457_s7 }
  0x12   : > { %s364_s13 = sshll.u32 (!%p212_p10), %s360_s10, 4  ;;  %s365_s13 = int_to_ptr.hbm [resolvable:$true] %s364_s13 }
  0x13   : > { %s531_s14 = sshra.s32 (!%p212_p10), %s365_s13, 4  ;;  %s532_s14 = int_to_ptr.hbm [resolvable:$true] %s531_s14 }
  0x14   : > { %v316_v0 = vld [vmem:[%s739_s2] sm:$0xff]  ;;  %v597_v1 = vmov 0   ;;  %s245_s11 = scalar_select %p244_p11, %s587_s21, 1  ;;  %vm269_vm0 = vcmask 1043456   ;;  %vm265_vm1 = vcmask 293888  }
  0x15   : > { %515 = vset.pattern.permute.xlu0 %v597_v1  ;;  %516 = vset.pattern.permute.xlu1 %v597_v1  ;;  %v334_v2 = vld [vmem:[%s741_s4] sm:$0xff]  ;;  %s347_s21 = scalar_lea.sflag [#allocation3], %s240_s27  ;;  %p538_p1 = scmp.lt.s32.totalorder %s532_s14, %s742_s5 }
  0x16   : > { %319 = vperm.xlu0 %515, %v316_v0   ;;  %337 = vperm.xlu1 %516, %v334_v2   ;;  %s458_s12 = smul.u32 80, %s245_s11  ;;  %v324_v7 = vld [vmem:[%s740_s3] sm:$0xff]  ;;  %s242_s11 = scalar_lea.vmem [#allocation2], %s446_s29 }
  0x17   : > { %v264_v14 = vld [vmem:[%s738_s1] sm:$0xff] }
  0x18   : > { %s251_s15 = scalar_lea.vmem %s737_s0, %s458_s12  ;;  %s362_s12 = sshll.u32 %s242_s11, 4  ;;  %s363_s12 = int_to_ptr.vmem [resolvable:$true] %s362_s12 }
  0x19   : > { %v262_v3 = vld [vmem:[%s251_s15 + $0x40] sm:$0xf]  ;;  %v263_v4 = vld [vmem:[%s251_s15 + $0x48] sm:$0xf]  ;;  %v260_v5 = vld [vmem:[%s251_s15 + $0x30] sm:$0xff] }
  0x1a   : > { %448 = vmatpush.msk.msra.mxu0 %vm269_vm0, %v262_v3  ;;  %450 = vmatpush.msk.msra.mxu1 %vm269_vm0, %v263_v4  ;;  %v261_v6 = vld [vmem:[%s251_s15 + $0x38] sm:$0xff]  ;;  %v258_v8 = vld [vmem:[%s251_s15 + $0x20] sm:$0xff]  ;;  %v259_v9 = vld [vmem:[%s251_s15 + $0x28] sm:$0xff] }
  0x1b   : > { %v256_v10 = vld [vmem:[%s251_s15 + $0x10] sm:$0xff]  ;;  %v257_v11 = vld [vmem:[%s251_s15 + $0x18] sm:$0xff]  ;;  %v254_v12 = vld [vmem:[%s251_s15] sm:$0xff] }
  0x1c   : > { %288 = vmatpush.msra.mxu0 %v260_v5  ;;  %308 = vmatpush.msra.mxu1 %v261_v6  ;;  %v255_v13 = vld [vmem:[%s251_s15 + $0x8] sm:$0xff]  ;;  %s533_s15 = scalar_lea.hbm %s532_s14, 16 }
  0x1d   : > { %p534_p12 = scmp.ne.s32.totalorder %s532_s14, %s533_s15  ;;  %p539_p2 = scmp.lt.s32.totalorder %s537_s24, %s533_s15 }
  0x1e   : > { %327 = vperm.xlu0 %515, %v324_v7   ;;  %289 = vmatpush.msra.mxu0 %v258_v8 }
  0x1f   : > { %309 = vmatpush.msra.mxu1 %v259_v9  ;;  %p535_p13 = pnand %p534_p12, %p668_p4  ;;  %p540_p3 = por %p539_p2, %p538_p1 }
  0x20   : > { %290 = vmatpush.msra.mxu0 %v256_v10 }
  0x21   : > { %310 = vmatpush.msra.mxu1 %v257_v11  ;;  %p536_p0 = pneg %p535_p13 }
  0x22   : > { %291 = vmatpush.msra.mxu0 %v254_v12 }
  0x23   : > { %311 = vmatpush.msra.mxu1 %v255_v13  ;;  %449 = vmatmul.msk.f32.vlgmr.msra.gmra.mxu0 %vm265_vm1, %v264_v14  ;;  %p541_p5 = pnand %p540_p3, %p536_p0 }
  0x24   : > { %451 = vmatmul.msk.f32.vlgmr.msra.gmra.mxu1 %vm265_vm1, %v264_v14 }
  0x88   : > { %v320_v15 = vpop.permute.xlu0 %319  ;;  %v338_v21 = vpop.permute.xlu1 %337 }
  0x90   : > { %v328_v20 = vpop.permute.xlu0 %327 }
  0xa0   : > { %v293_v16 = vpop.f32.mrf.mxu0 }
  0xa1   : > { %v313_v17 = vpop.f32.mrf.mxu1  ;;  %v322_v18 = vmul.f32 %v320_v15, %v293_v16 }
  0xa2   : > { %v323_v19 = vmul.f32 %v320_v15, %v313_v17 }
  0xa3   : > { %v330_v22 = vadd.f32 %v328_v20, %v322_v18 }
  0xa4   : > { %v331_v23 = vadd.f32 %v328_v20, %v323_v19 }
  0xa5   : > { %vm332_vm2 = vcmp.ge.f32.partialorder %v330_v22, 0.0  ;;  %v340_v24 = vmul.f32 %v338_v21, %v330_v22 }
  0xa6   : > { %vm333_vm3 = vcmp.ge.f32.partialorder %v331_v23, 0.0  ;;  %v341_v25 = vmul.f32 %v338_v21, %v331_v23 }
  0xa7   : > { %v342_v26 = vsel %vm332_vm2, %v330_v22, %v340_v24 }
  0xa8   : > { %v343_v27 = vsel %vm333_vm3, %v331_v23, %v341_v25  ;;  %344 = vst [vmem:[%s242_s11] sm:$0xff] %v342_v26 }
  0xa9   : > { %345 = vst [vmem:[%s242_s11 + $0x8] sm:$0xff] %v343_v27 }
  0xaa   : > { %544 = shalt.err (!%p541_p5)
}
  0xab   : > { %459 = dma.vmem_to_hbm [thread:$0]  (%p668_p4), %s363_s12, 256, %s365_s13, %s347_s21  }
  0xac PF: > { %p465_p6 = scmp.ge.s32.totalorder %s595_s23, 2  ;;  %s376_s27 = sand.u32 1, %s575_s18  }
  0xad   : > { %s377_s7 = scalar_lea.sflag [#allocation3], %s376_s27 }
  0xae   : > { %p462_p7 = pnand %p465_p6, %p675_p8 }
  0xb0   : > { %p463_p9 = pneg %p462_p7 }
  0xb2   : > { %570 = dma.done.wait (%p463_p9), %s377_s7, 256  }
  0xb3   : > { %572 = vsyncadd (%p463_p9), %s377_s7, 4294967040  ;;  %s18_s23 = sadd.s32 1, %s595_s23   ;;  %s745_s18 = smov %s579_s19 }
  0xb4   : > { %p15_p10 = scmp.ge.s32.totalorder %s18_s23, 4   ;;  %s746_s19 = smov %s583_s20 }
  0xb5   : > { %s747_s20 = smov %s681_s6  ;;  %s748_s21 = smov %s591_s22 }
  0xb6   : > { %s749_s22 = smov %s751_s26  ;;  %17 = sbr.rel (!%p15_p10) target bundleno = 4 (0x4), region = 75 }
  0xbb   :  { %383 = vsyncpa [#allocation3], 1 }
  0xbc   :  { %385 = vsyncpa [#allocation3 + $0x1], 1 }

</bundles_post_ra>
